<compile_context>
chip_gen: v6e
topology: v6e:2x2x1
jax: 0.10.0
libtpu: 0.0.40
codegen_flags: <defaults>
</compile_context>

<pallas_src>
import functools

import jax
import jax.numpy as jnp
from jax import lax
from jax.experimental import pallas as pl
from jax.experimental.pallas import tpu as pltpu


_NEG_INF = -1e30


# --------------------------------------------------------------------------
# Tile picking: largest tile <= target that divides dim, preferring MXU-
# friendly alignment (256/128) and falling back gracefully for small dims.
# --------------------------------------------------------------------------
def _pick_tile(dim, target, align):
    if dim <= target:
        return dim
    for a in (align, 128, 8):
        if a > dim:
            continue
        t = (min(target, dim) // a) * a
        while t >= a:
            if dim % t == 0:
                return t
            t -= a
    return dim


# --------------------------------------------------------------------------
# Tiled GEMM:  y = x @ w_t  (bf16 operands, f32 accumulation)
# --------------------------------------------------------------------------
def _matmul_kernel(x_ref, w_ref, o_ref, acc_ref):
    @pl.when(pl.program_id(2) == 0)
    def _():
        acc_ref[...] = jnp.zeros(acc_ref.shape, jnp.float32)

    acc_ref[...] += jnp.dot(
        x_ref[...], w_ref[...], preferred_element_type=jnp.float32
    )

    @pl.when(pl.program_id(2) == pl.num_programs(2) - 1)
    def _():
        o_ref[...] = acc_ref[...].astype(o_ref.dtype)


def matmul(x, w_t, *, out_dtype=None, tm_target=256, tn_target=512, tk_target=1024):
    M, K = x.shape
    _, N = w_t.shape
    out_dtype = x.dtype if out_dtype is None else out_dtype
    tm = _pick_tile(M, tm_target, 256)
    tn = _pick_tile(N, tn_target, 128)
    tk = _pick_tile(K, tk_target, 128)
    grid = (M // tm, N // tn, K // tk)
    return pl.pallas_call(
        _matmul_kernel,
        out_shape=jax.ShapeDtypeStruct((M, N), out_dtype),
        grid=grid,
        in_specs=[
            pl.BlockSpec((tm, tk), lambda i, j, k: (i, k)),
            pl.BlockSpec((tk, tn), lambda i, j, k: (k, j)),
        ],
        out_specs=pl.BlockSpec((tm, tn), lambda i, j, k: (i, j)),
        scratch_shapes=[pltpu.VMEM((tm, tn), jnp.float32)],
        compiler_params=pltpu.CompilerParams(
            dimension_semantics=("parallel", "parallel", "arbitrary")
        ),
    )(x, w_t)


# --------------------------------------------------------------------------
# QKV prep: reads the fused-projection slab (B, S, Htot, D) (a free view of
# the GEMM output), applies RoPE to Q (scale folded in) and K, passes V
# through, and writes head-major (B, H, S, D) layouts for the flash kernel.
# This replaces the separate slice / reshape / transpose HBM round trips.
# --------------------------------------------------------------------------
def _qkv_prep_kernel(x_ref, cos_ref, sin_ref, q_ref, k_ref, v_ref, *, hq, hkv, scale):
    cos = cos_ref[...]                      # (ts, D) f32, = [cos, cos]
    sin = sin_ref[...]                      # (ts, D) f32, = [-sin, sin]
    cos_q = cos * scale                     # softmax scale folded into Q rope
    sin_q = sin * scale
    d = cos.shape[-1]

    def rope(xh, c, s):
        xf = xh.astype(jnp.float32)
        if d % 128 == 0:
            rot = pltpu.roll(xf, shift=d // 2, axis=-1)     # XLU rotate-half
        else:
            rot = jnp.concatenate([xf[:, d // 2:], xf[:, : d // 2]], axis=-1)
        return xf * c + rot * s

    for h in range(hq):
        q_ref[h] = rope(x_ref[:, h, :], cos_q, sin_q).astype(q_ref.dtype)
    for h in range(hkv):
        k_ref[h] = rope(x_ref[:, hq + h, :], cos, sin).astype(k_ref.dtype)
    for h in range(hkv):
        v_ref[h] = x_ref[:, hq + hkv + h, :]


def qkv_prep(qkv4, cos_cat, sin_sgn, *, hq, hkv, scale, ts_target=256):
    B, S, Htot, D = qkv4.shape
    ts = _pick_tile(S, ts_target, 128)
    kernel = functools.partial(_qkv_prep_kernel, hq=hq, hkv=hkv, scale=scale)
    return pl.pallas_call(
        kernel,
        out_shape=(
            jax.ShapeDtypeStruct((B, hq, S, D), qkv4.dtype),
            jax.ShapeDtypeStruct((B, hkv, S, D), qkv4.dtype),
            jax.ShapeDtypeStruct((B, hkv, S, D), qkv4.dtype),
        ),
        grid=(B, S // ts),
        in_specs=[
            pl.BlockSpec((None, ts, Htot, D), lambda b, si: (b, si, 0, 0)),
            pl.BlockSpec((ts, D), lambda b, si: (si, 0)),
            pl.BlockSpec((ts, D), lambda b, si: (si, 0)),
        ],
        out_specs=(
            pl.BlockSpec((None, hq, ts, D), lambda b, si: (b, 0, si, 0)),
            pl.BlockSpec((None, hkv, ts, D), lambda b, si: (b, 0, si, 0)),
            pl.BlockSpec((None, hkv, ts, D), lambda b, si: (b, 0, si, 0)),
        ),
        compiler_params=pltpu.CompilerParams(
            dimension_semantics=("parallel", "parallel")
        ),
    )(qkv4, cos_cat, sin_sgn)


# --------------------------------------------------------------------------
# GQA-fused online-softmax flash attention.
# Grid = (B, Hkv, q_tiles, kv_tiles): each step handles ALL `group` Q heads of
# one KV group against one K/V tile, so K/V is fetched once per group.
# Softmax scale is pre-folded into Q by qkv_prep.
# --------------------------------------------------------------------------
def _flash_kernel(q_ref, k_ref, v_ref, o_ref, m_ref, l_ref, acc_ref, *,
                  causal, group, tq, tkv):
    ki = pl.program_id(3)
    nkv = pl.num_programs(3)
    q_start = pl.program_id(2) * tq
    kv_start = ki * tkv

    @pl.when(ki == 0)
    def _():
        m_ref[...] = jnp.full(m_ref.shape, _NEG_INF, jnp.float32)
        l_ref[...] = jnp.zeros(l_ref.shape, jnp.float32)
        acc_ref[...] = jnp.zeros(acc_ref.shape, jnp.float32)

    def body():
        k = k_ref[...]                      # (tkv, D), shared by the whole group
        v = v_ref[...]
        if causal:
            row = q_start + lax.broadcasted_iota(jnp.int32, (tq, tkv), 0)
            col = kv_start + lax.broadcasted_iota(jnp.int32, (tq, tkv), 1)
            mask = col <= row
        for g in range(group):              # unrolled: all Q heads of the group
            q_g = q_ref[g]                  # (tq, D) bf16, scale pre-folded
            s = lax.dot_general(            # contract on D (no k.T relayout)
                q_g, k, (((1,), (1,)), ((), ())),
                preferred_element_type=jnp.float32)
            if causal:
                s = jnp.where(mask, s, _NEG_INF)
            m_prev = m_ref[g]
            m_new = jnp.maximum(m_prev, jnp.max(s, axis=-1, keepdims=True))
            alpha = jnp.exp(m_prev - m_new)
            p = jnp.exp(s - m_new)
            l_ref[g] = alpha * l_ref[g] + jnp.sum(p, axis=-1, keepdims=True)
            acc_ref[g] = alpha * acc_ref[g] + jnp.dot(
                p.astype(v.dtype), v, preferred_element_type=jnp.float32)
            m_ref[g] = m_new

    if causal:
        # Compute skip for fully-masked tiles (their DMA is also elided by the
        # clamped kv index_map below, which repeats the previous block index).
        @pl.when(kv_start <= q_start + tq - 1)
        def _():
            body()
    else:
        body()

    @pl.when(ki == nkv - 1)
    def _():
        for g in range(group):
            # exact normalization (finalize-only, negligible cost)
            o_ref[g] = (acc_ref[g] / l_ref[g]).astype(o_ref.dtype)


def flash_attention(q, k, v, *, causal, tq_target=256, tkv_target=512):
    # q: (B, Hq, S, D) with softmax scale folded in; k, v: (B, Hkv, Skv, D)
    B, Hq, S, D = q.shape
    Hkv, Skv = k.shape[1], k.shape[2]
    group = Hq // Hkv
    tq = _pick_tile(S, tq_target, 128)
    tkv = _pick_tile(Skv, tkv_target, 128)
    grid = (B, Hkv, S // tq, Skv // tkv)

    if causal:
        def kv_map(b, kvh, qi, ki):
            last = (qi * tq + tq - 1) // tkv      # last tile touching the diagonal
            return (b, kvh, jnp.minimum(ki, last), 0)
    else:
        def kv_map(b, kvh, qi, ki):
            return (b, kvh, ki, 0)

    kernel = functools.partial(
        _flash_kernel, causal=causal, group=group, tq=tq, tkv=tkv)
    # TODO(synk): for head_dim < 128, pack the group into a lane-dense
    # (tq, group*D) output slab to avoid masked partial stores.
    return pl.pallas_call(
        kernel,
        out_shape=jax.ShapeDtypeStruct((B, Hq, S, D), q.dtype),
        grid=grid,
        in_specs=[
            pl.BlockSpec((None, group, tq, D), lambda b, kvh, qi, ki: (b, kvh, qi, 0)),
            pl.BlockSpec((None, None, tkv, D), kv_map),
            pl.BlockSpec((None, None, tkv, D), kv_map),
        ],
        out_specs=pl.BlockSpec(
            (None, group, tq, D), lambda b, kvh, qi, ki: (b, kvh, qi, 0)),
        scratch_shapes=[
            pltpu.VMEM((group, tq, 1), jnp.float32),   # running max
            pltpu.VMEM((group, tq, 1), jnp.float32),   # running sum
            pltpu.VMEM((group, tq, D), jnp.float32),   # output accumulator
        ],
        compiler_params=pltpu.CompilerParams(
            dimension_semantics=("parallel", "parallel", "parallel", "arbitrary")
        ),
    )(q, k, v)


# --------------------------------------------------------------------------
# Output projection reading the flash output directly in (B, Hq, S, D) layout
# (contraction over heads folded into the kernel -> no XLA transpose).
# w3 = wo.T reshaped to (Hq, D, hidden), bf16.
# --------------------------------------------------------------------------
def _out_proj_kernel(x_ref, w_ref, o_ref, *, nheads):
    acc = jnp.zeros(o_ref.shape, jnp.float32)
    for h in range(nheads):
        acc += jnp.dot(x_ref[h], w_ref[h], preferred_element_type=jnp.float32)
    o_ref[...] = acc.astype(o_ref.dtype)


def out_proj(attn, w3, *, out_dtype=jnp.float32, tm_target=256, tn_target=512):
    B, Hq, S, D = attn.shape
    N = w3.shape[-1]
    tm = _pick_tile(S, tm_target, 128)
    tn = _pick_tile(N, tn_target, 128)
    kernel = functools.partial(_out_proj_kernel, nheads=Hq)
    return pl.pallas_call(
        kernel,
        out_shape=jax.ShapeDtypeStruct((B, S, N), out_dtype),
        grid=(B, S // tm, N // tn),
        in_specs=[
            pl.BlockSpec((None, Hq, tm, D), lambda b, i, j: (b, 0, i, 0)),
            pl.BlockSpec((Hq, D, tn), lambda b, i, j: (0, 0, j)),
        ],
        out_specs=pl.BlockSpec((None, tm, tn), lambda b, i, j: (b, i, j)),
        compiler_params=pltpu.CompilerParams(
            dimension_semantics=("parallel", "parallel", "parallel")
        ),
    )(attn, w3)


# --------------------------------------------------------------------------
# Attention module (tp_world_size = 1; weights initialized in-script)
# --------------------------------------------------------------------------
class Attention:
    def __init__(self, hidden_size, num_heads, num_kv_heads, key):
        self.hidden_size = hidden_size
        self.num_heads = num_heads          # == num_local_heads (tp_world_size=1)
        self.num_kv = num_kv_heads          # == num_local_kv_heads
        self.head_dim = hidden_size // num_heads
        k1, k2, k3, k4 = jax.random.split(key, 4)
        std = 0.02
        D = self.head_dim
        # f32 master weights (used by the pure-JAX reference)
        self.wq = jax.random.normal(k1, (num_heads * D, hidden_size), jnp.float32) * std
        self.wk = jax.random.normal(k2, (num_kv_heads * D, hidden_size), jnp.float32) * std
        self.wv = jax.random.normal(k3, (num_kv_heads * D, hidden_size), jnp.float32) * std
        self.wo = jax.random.normal(k4, (hidden_size, hidden_size), jnp.float32) * std
        # Kernel weights: fused QKV, pre-transposed ONCE, stored bf16 (MXU-native).
        self.w_qkv_t = jnp.concatenate(
            [self.wq, self.wk, self.wv], axis=0).T.astype(jnp.bfloat16)
        # out-proj weight as (Hq, D, hidden) bf16 for head-contraction GEMM.
        self.wo_t3 = self.wo.T.reshape(num_heads, D, hidden_size).astype(jnp.bfloat16)

    def __call__(self, x, cos, sin):
        # x: (B, S, H); cos/sin: (S, >= head_dim // 2)
        B, S, H = x.shape
        D = self.head_dim
        Hq, Hkv = self.num_heads, self.num_kv
        Htot = Hq + 2 * Hkv

        # Fused Q/K/V projection: single bf16 GEMM, output kept bf16.
        x2d = x.reshape(B * S, H).astype(jnp.bfloat16)
        qkv = matmul(x2d, self.w_qkv_t, out_dtype=jnp.bfloat16)   # (B*S, Htot*D)
        qkv4 = qkv.reshape(B, S, Htot, D)                          # free view

        # Full-width rope tables: cos_cat=[cos,cos], sin_sgn=[-sin,sin].
        d2 = D // 2
        ch, sh = cos[:, :d2], sin[:, :d2]
        cos_cat = jnp.concatenate([ch, ch], axis=-1).astype(jnp.float32)   # (S, D)
        sin_sgn = jnp.concatenate([-sh, sh], axis=-1).astype(jnp.float32)  # (S, D)

        # RoPE + head scatter (softmax scale folded into Q); no XLA transposes.
        scale = 1.0 / (D ** 0.5)
        q, k, v = qkv_prep(qkv4, cos_cat, sin_sgn, hq=Hq, hkv=Hkv, scale=scale)

        causal = q.shape[2] == k.shape[2]      # same semantic as the PyTorch spec
        attn = flash_attention(q, k, v, causal=causal)    # (B, Hq, S, D) bf16

        # Output projection straight from (B, Hq, S, D) -> (B, S, H) f32.
        return out_proj(attn, self.wo_t3, out_dtype=jnp.float32)


# --------------------------------------------------------------------------
# Pure-JAX f32 reference (for correctness check)
# --------------------------------------------------------------------------
def reference_forward(x, cos, sin, attn):
    B, S, H = x.shape
    D = attn.head_dim
    x2d = x.reshape(B * S, H)
    q = (x2d @ attn.wq.T).reshape(B, S, attn.num_heads, D)
    k = (x2d @ attn.wk.T).reshape(B, S, attn.num_kv, D)
    v = (x2d @ attn.wv.T).reshape(B, S, attn.num_kv, D)

    def rope(t):
        d2 = D // 2
        c = cos[None, :, None, :d2]
        s_ = sin[None, :, None, :d2]
        t1, t2 = t[..., :d2], t[..., d2:]
        return jnp.concatenate([t1 * c - t2 * s_, t2 * c + t1 * s_], axis=-1)

    q, k = rope(q), rope(k)
    q = q.transpose(0, 2, 1, 3)
    k = k.transpose(0, 2, 1, 3)
    v = v.transpose(0, 2, 1, 3)
    rep = attn.num_heads // attn.num_kv
    k = jnp.repeat(k, rep, axis=1)
    v = jnp.repeat(v, rep, axis=1)

    scale = 1.0 / (D ** 0.5)
    s = jnp.einsum("bhqd,bhkd->bhqk", q, k) * scale
    mask = jnp.tril(jnp.ones((S, S), dtype=bool))
    s = jnp.where(mask, s, -jnp.inf)
    p = jax.nn.softmax(s, axis=-1)
    o = jnp.einsum("bhqk,bhkd->bhqd", p, v)
    o = o.transpose(0, 2, 1, 3).reshape(B * S, attn.num_heads * D)
    return (o @ attn.wo.T).reshape(B, S, H)


if __name__ == "__main__":
    key = jax.random.PRNGKey(0)
    kx, kp = jax.random.split(key)

    B, S, H = 2, 8, 32
    num_heads, num_kv = 4, 2
    head_dim = H // num_heads

    x = jax.random.normal(kx, (B, S, H), jnp.float32)
    attn = Attention(H, num_heads, num_kv, kp)

    # rotary tables (seq, head_dim // 2)
    inv_freq = 1.0 / (10000.0 ** (jnp.arange(0, head_dim, 2, dtype=jnp.float32) / head_dim))
    t = jnp.arange(S, dtype=jnp.float32)
    freqs = jnp.outer(t, inv_freq)
    cos, sin = jnp.cos(freqs), jnp.sin(freqs)

    out = attn(x, cos, sin)
    out = jax.block_until_ready(out)

    ref = reference_forward(x, cos, sin, attn)
    assert out.shape == (B, S, H)
    max_err = float(jnp.max(jnp.abs(out - ref)))
    # bf16 operands (f32 accumulation) vs f32 reference -> loosened tolerance.
    assert jnp.allclose(out, ref, atol=5e-3, rtol=5e-2), (
        f"Pallas output mismatch vs reference (max abs err {max_err})")

    print("KERNEL_OK")
</pallas_src>

<mosaic_0001>
module attributes {stable_mosaic.version = 11 : i64} {
  func.func @_matmul_kernel(%arg0: i32, %arg1: i32, %arg2: i32, %arg3: memref<16x32xbf16, #tpu.memory_space<vmem>>, %arg4: memref<32x64xbf16, #tpu.memory_space<vmem>>, %arg5: memref<16x64xbf16, #tpu.memory_space<vmem>>, %arg6: memref<16x64xf32, #tpu.memory_space<vmem>>) attributes {dimension_semantics = [#tpu.dimension_semantics<parallel>, #tpu.dimension_semantics<parallel>, #tpu.dimension_semantics<arbitrary>], iteration_bounds = array<i64: 1, 1, 1>, scalar_prefetch = 0 : i64, scratch_operands = 1 : i64, tpu.core_type = #tpu.core_type<tc>, window_params = [{transform_indices = @transform_0, window_bounds = array<i64: 16, 32>}, {transform_indices = @transform_1, window_bounds = array<i64: 32, 64>}, {transform_indices = @transform_2, window_bounds = array<i64: 16, 64>}]} {
    %c0_i32 = arith.constant 0 : i32
    %0 = arith.cmpi eq, %arg2, %c0_i32 : i32
    %1 = arith.extui %0 : i1 to i32
    %c0_i32_0 = arith.constant 0 : i32
    %2 = arith.cmpi ne, %1, %c0_i32_0 : i32
    scf.if %2 {
      %cst_10 = arith.constant 0.000000e+00 : f32
      %12 = vector.broadcast %cst_10 : f32 to vector<16x64xf32>
      %c0_11 = arith.constant 0 : index
      %c0_12 = arith.constant 0 : index
      %13 = vector.load %arg6[%c0_11, %c0_12] : memref<16x64xf32, #tpu.memory_space<vmem>>, vector<16x64xf32>
      tpu.vector_store %arg6[%c0_11, %c0_12], %12 {strides = array<i32>} : memref<16x64xf32, #tpu.memory_space<vmem>>, vector<16x64xf32>,
    } else {
    }
    %c0 = arith.constant 0 : index
    %c0_1 = arith.constant 0 : index
    %3 = vector.load %arg6[%c0, %c0_1] : memref<16x64xf32, #tpu.memory_space<vmem>>, vector<16x64xf32>
    %c0_2 = arith.constant 0 : index
    %c0_3 = arith.constant 0 : index
    %4 = vector.load %arg3[%c0_2, %c0_3] : memref<16x32xbf16, #tpu.memory_space<vmem>>, vector<16x32xbf16>
    %c0_4 = arith.constant 0 : index
    %c0_5 = arith.constant 0 : index
    %5 = vector.load %arg4[%c0_4, %c0_5] : memref<32x64xbf16, #tpu.memory_space<vmem>>, vector<32x64xbf16>
    %cst = arith.constant dense<0.000000e+00> : vector<16x64xf32>
    %6 = tpu.matmul %4, %5, %cst {dimension_numbers = #tpu.dot_dimension_numbers<[1], [0], [0], [1], [0, 0, 1, 1], [], []>} : vector<16x32xbf16>, vector<32x64xbf16>, vector<16x64xf32> -> vector<16x64xf32>
    %7 = arith.addf %3, %6 : vector<16x64xf32>
    %c0_6 = arith.constant 0 : index
    %c0_7 = arith.constant 0 : index
    %8 = vector.load %arg6[%c0_6, %c0_7] : memref<16x64xf32, #tpu.memory_space<vmem>>, vector<16x64xf32>
    tpu.vector_store %arg6[%c0_6, %c0_7], %7 {strides = array<i32>} : memref<16x64xf32, #tpu.memory_space<vmem>>, vector<16x64xf32>,
    %c0_i32_8 = arith.constant 0 : i32
    %9 = arith.cmpi eq, %arg2, %c0_i32_8 : i32
    %10 = arith.extui %9 : i1 to i32
    %c0_i32_9 = arith.constant 0 : i32
    %11 = arith.cmpi ne, %10, %c0_i32_9 : i32
    scf.if %11 {
      %c0_10 = arith.constant 0 : index
      %c0_11 = arith.constant 0 : index
      %12 = vector.load %arg6[%c0_10, %c0_11] : memref<16x64xf32, #tpu.memory_space<vmem>>, vector<16x64xf32>
      %13 = arith.truncf %12 : vector<16x64xf32> to vector<16x64xbf16>
      %c0_12 = arith.constant 0 : index
      %c0_13 = arith.constant 0 : index
      %14 = vector.load %arg5[%c0_12, %c0_13] : memref<16x64xbf16, #tpu.memory_space<vmem>>, vector<16x64xbf16>
      tpu.vector_store %arg5[%c0_12, %c0_13], %13 {strides = array<i32>} : memref<16x64xbf16, #tpu.memory_space<vmem>>, vector<16x64xbf16>,
    } else {
    }
    return
  }
  func.func @transform_0(%arg0: i32, %arg1: i32, %arg2: i32) -> (i32, i32) {
    %c0_i32 = arith.constant 0 : i32
    return %arg0, %arg2 : i32, i32
  }
  func.func @transform_1(%arg0: i32, %arg1: i32, %arg2: i32) -> (i32, i32) {
    %c0_i32 = arith.constant 0 : i32
    return %arg2, %arg1 : i32, i32
  }
  func.func @transform_2(%arg0: i32, %arg1: i32, %arg2: i32) -> (i32, i32) {
    %c0_i32 = arith.constant 0 : i32
    return %arg0, %arg1 : i32, i32
  }
}

</mosaic_0001>

<bundles_post_ra>
// kernel: tpu_custom_call.1
= control target key start
LH: loop header
LB: loop body
LE: loop exit
PB: predicated region body
PF: predicated region fallthrough
CT: control target
= control target key end

     0   :  { %7 = vsyncpa [#allocation4], 0  ;;  %s296_s0 = inlined_call_operand.hbm [shape: bf16[16,32], index: 0, kind: input, shape index: {}]   ;;  %s297_s1 = inlined_call_operand.hbm [shape: bf16[32,64], index: 1, kind: input, shape index: {}]   ;;  %s298_s2 = inlined_call_operand.hbm [shape: bf16[16,64], index: 2, kind: output, shape index: {}]  }
   0x1   :  { %8 = vsyncpa [#allocation7], 0 }
   0x2   :  { %9 = vsyncpa [#allocation5], 0  ;;  %s252_s9 = smov [#allocation3]  }
   0x3   :  { %s15_s10 = sshll.u32 %s252_s9, 4  ;;  %s16_s10 = int_to_ptr.vmem [resolvable:$true] %s15_s10 }
   0x4   :  { %s194_s11 = scalar_lea.vmem %s16_s10, 128  ;;  %p199_p1 = scmp.lt.s32.totalorder %s16_s10, %s16_s10 }
   0x5   :  { %p195_p0 = scmp.ne.s32.totalorder %s16_s10, %s194_s11  ;;  %p200_p2 = scmp.lt.s32.totalorder %s194_s11, %s194_s11 }
   0x7   :  { %p201_p3 = por %p200_p2, %p199_p1 }
   0x9   :  { %p202_p4 = pnand %p201_p3, %p195_p0 }
   0xb   :  { %205 = shalt.err (!%p202_p4)
}
   0xc   :  { %s253_s12 = smov 64   ;;  %s254_s13 = smov 4  }
   0xd   :  { %21 = dma.hbm_to_vmem [thread:$0]  %s296_s0, 128, %s16_s10, [#allocation4], %s253_s12, %s253_s12, %s254_s13  }
   0xe   :  { %s255_s16 = smov [#allocation6]  }
   0xf   :  { %s27_s17 = sshll.u32 %s255_s16, 4  ;;  %s28_s17 = int_to_ptr.vmem [resolvable:$true] %s27_s17 }
  0x10   :  { %s214_s18 = scalar_lea.vmem %s28_s17, 256  ;;  %p219_p6 = scmp.lt.s32.totalorder %s28_s17, %s28_s17 }
  0x11   :  { %p215_p5 = scmp.ne.s32.totalorder %s28_s17, %s214_s18  ;;  %p220_p7 = scmp.lt.s32.totalorder %s214_s18, %s214_s18 }
  0x13   :  { %p221_p8 = por %p220_p7, %p219_p6 }
  0x15   :  { %p222_p9 = pnand %p221_p8, %p215_p5 }
  0x17   :  { %225 = shalt.err (!%p222_p9)
}
  0x18   :  { %33 = dma.hbm_to_vmem [thread:$0]  %s297_s1, 256, %s28_s17, [#allocation7], %s253_s12, %s253_s12, %s254_s13  }
  0x19   :  { %246 = dma.done.wait [#allocation4], 128  }
  0x1a   :  { %247 = vsyncadd [#allocation4], 4294967168 }
  0x1b   :  { %248 = dma.done.wait [#allocation7], 256  }
  0x1c   :  { %249 = vsyncadd [#allocation7], 4294967040  ;;  %vm45_vm0 = vcmask 523264   ;;  %v256_v0 = vmov 0.0   ;;  %vm257_vm1 = vmmov 0   ;;  %v183_v1 = vld [vmem:[#allocation6 + $0x8] sm:$0xff]  }
  0x1d   :  { %46 = vst.msk [vmem:[#allocation2] sm:$0xff] %vm45_vm0, %v256_v0  ;;  %47 = vst.msk [vmem:[#allocation2 + $0x8] sm:$0xff] %vm45_vm0, %v256_v0  ;;  %168 = vmatprep.subr.bf16.mxu0 %v256_v0  ;;  %172 = vmatprep.mubr.msk.bf16.mxu0 %vm257_vm1, %v256_v0  ;;  %v184_v2 = vld [vmem:[#allocation6] sm:$0xff]   ;;  %v185_v3 = vld [vmem:[#allocation3] sm:$0xff]   ;;  %vm73_vm2 = vcmask 261120   ;;  %vm136_vm3 = vcmask 519168  }
  0x1e   :  { %169 = vmatpush3.bf16.msra.mxu0 %v183_v1  ;;  %s258_s0 = smov [#allocation8]  }
  0x1f   :  { %170 = vmatprep.subr.bf16.mxu0 %v256_v0  ;;  %s144_s1 = sshll.u32 %s258_s0, 4  ;;  %s145_s1 = int_to_ptr.vmem [resolvable:$true] %s144_s1 }
  0x20   :  { %s226_s21 = scalar_lea.vmem %s145_s1, 128  ;;  %p231_p11 = scmp.lt.s32.totalorder %s145_s1, %s145_s1 }
  0x21   :  { %p227_p10 = scmp.ne.s32.totalorder %s145_s1, %s226_s21  ;;  %p232_p12 = scmp.lt.s32.totalorder %s226_s21, %s226_s21 }
  0x22   :  { %171 = vmatpush3.bf16.msra.mxu0 %v184_v2 }
  0x23   :  { %p233_p13 = por %p232_p12, %p231_p11 }
  0x24   :  { %v48_v4 = vld [vmem:[#allocation2] sm:$0xff]  ;;  %v49_v8 = vld [vmem:[#allocation2 + $0x8] sm:$0xff] }
  0x25   :  { %173 = vmatmul.mubr.msk.bf16.vlgmr.msra.gmra.mxu0 %vm73_vm2, %v185_v3  ;;  %p234_p0 = pnand %p233_p13, %p227_p10 }
  0xe5   :  { %v111_v5 = vpop.f32.mrf.mxu0 }
  0xe6   :  { %v118_v6 = vadd.f32 %v111_v5, %v48_v4 }
  0xe7   :  { %v174_v7 = vpop.f32.mrf.mxu0 }
  0xe8   :  { %121 = vst.msk [vmem:[#allocation2] sm:$0xff] %vm45_vm0, %v118_v6 }
  0xe9   :  { %v114_v9 = vpop.f32.mrf.mxu0 }
  0xea   :  { %v119_v10 = vadd.f32 %v114_v9, %v49_v8 }
  0xeb   :  { %v175_v11 = vpop.f32.mrf.mxu0 }
  0xec   :  { %122 = vst.msk [vmem:[#allocation2 + $0x8] sm:$0xff] %vm45_vm0, %v119_v10 }
  0xef   :  { %v126_v12 = vld [vmem:[#allocation2] sm:$0xff] }
  0xf0   :  { %v163_v13 = vpack.c.bf16 %v126_v12, %v126_v12 }
  0xf2   :  { %137 = vst.msk [vmem:[#allocation8] sm:$0xf] %vm136_vm3, %v163_v13 }
  0xf3   :  { %v127_v14 = vld [vmem:[#allocation2 + $0x8] sm:$0xff] }
  0xf4   :  { %v164_v15 = vpack.c.bf16 %v127_v14, %v127_v14 }
  0xf6   :  { %138 = vst.msk [vmem:[#allocation8 + $0x4] sm:$0xf] %vm136_vm3, %v164_v15 }
  0xf7   :  { %237 = shalt.err (!%p234_p0)
}
  0xf8   :  { %150 = dma.vmem_to_hbm [thread:$0]  %s145_s1, 128, %s298_s2, [#allocation5], %s253_s12, %s253_s12, %s254_s13  }
  0xf9   :  { %250 = dma.done.wait [#allocation5], 128  }
  0xfa   :  { %251 = vsyncadd [#allocation5], 4294967168 }
  0xfb   :  { %154 = vsyncpa [#allocation4], 1 }
  0xfc   :  { %155 = vsyncpa [#allocation7], 1 }
  0xfd   :  { %156 = vsyncpa [#allocation5], 1 }

</bundles_post_ra>
